<compile_context>
chip_gen: v7x
topology: tpu7x:2x2x1
jax: 0.10.0
libtpu: 0.0.40
codegen_flags: <defaults>
</compile_context>

<pallas_src>
import functools

import jax
import jax.numpy as jnp
from jax.experimental import pallas as pl
from jax.experimental.pallas import tpu as pltpu


def _round_up(v, m):
    return (v + m - 1) // m * m


def _gin_fused_kernel(a_ref, x_ref, w_ref, b_ref, o_ref, *, eps, num_layers):
    """All GIN layers fused. Per layer:
         agg = A @ x                      (bf16 MXU, f32 accumulate)
         h   = (1 + eps) * x + agg        (f32 VPU)
         y   = h @ W' + b'                (BN already folded into W'/b')
         y   = relu(y)                    (all but last layer)
    """
    a = a_ref[...]            # (Npad, Npad) bf16, resident for all layers
    x = x_ref[...]            # (Npad, Dpad) f32
    for l in range(num_layers):
        agg = jnp.dot(a, x.astype(jnp.bfloat16),
                      preferred_element_type=jnp.float32)
        h = (1.0 + eps) * x + agg
        y = jnp.dot(h, w_ref[l], preferred_element_type=jnp.float32) + b_ref[l]
        if l < num_layers - 1:
            y = jnp.maximum(y, 0.0)
        x = y
    o_ref[...] = x.astype(o_ref.dtype)


def gin_forward(x, edge_index, params, *, eps=0.0):
    """Full GIN forward (inference): conv -> bn -> relu for all but last layer,
    executed as one fused Pallas kernel."""
    n, din = x.shape
    num_layers = len(params)
    dims = [din] + [p["w"].shape[1] for p in params]
    dout = dims[-1]

    # Lane-dense padding: feature dims and node count rounded up to 128.
    dpad = _round_up(max(dims), 128)
    npad = _round_up(max(n, 8), 128)

    # Dense adjacency A[dst, src] = multiplicity, so A @ x sums source-node
    # features into each destination node. bf16 is exact for counts <= 256.
    src, dst = edge_index[0], edge_index[1]
    adj = jnp.zeros((npad, npad), jnp.float32).at[dst, src].add(1.0)
    adj = adj.astype(jnp.bfloat16)

    # Zero-padded node features (padded rows/cols are inert: their A columns
    # are zero and their outputs are sliced off).
    x_pad = jnp.zeros((npad, dpad), jnp.float32).at[:n, :din].set(x)

    # Fold eval-mode BatchNorm into each layer's W/b, then stack + zero-pad.
    w_stack = jnp.zeros((num_layers, dpad, dpad), jnp.float32)
    b_stack = jnp.zeros((num_layers, 1, dpad), jnp.float32)
    for l, p in enumerate(params):
        w, b = p["w"], p["b"]
        di, do = w.shape
        if l < num_layers - 1:
            scale = p["bn_gamma"] * jax.lax.rsqrt(p["bn_var"] + 1e-5)  # (1, do)
            w = w * scale
            b = p["bn_beta"] + (b - p["bn_mean"]) * scale
        w_stack = w_stack.at[l, :di, :do].set(w)
        b_stack = b_stack.at[l, :, :do].set(b)

    kernel = functools.partial(_gin_fused_kernel, eps=eps,
                               num_layers=num_layers)

    out = pl.pallas_call(
        kernel,
        out_shape=jax.ShapeDtypeStruct((npad, dpad), jnp.float32),
        grid=(1,),
        in_specs=[
            pl.BlockSpec((npad, npad), lambda i: (0, 0)),              # A (bf16)
            pl.BlockSpec((npad, dpad), lambda i: (0, 0)),              # x
            pl.BlockSpec((num_layers, dpad, dpad), lambda i: (0, 0, 0)),  # W'
            pl.BlockSpec((num_layers, 1, dpad), lambda i: (0, 0, 0)),     # b'
        ],
        out_specs=pl.BlockSpec((npad, dpad), lambda i: (0, 0)),
        compiler_params=pltpu.CompilerParams(
            dimension_semantics=("arbitrary",),
            vmem_limit_bytes=64 * 1024 * 1024),
    )(adj, x_pad, w_stack, b_stack)

    return out[:n, :dout]


def init_gin_params(key, input_dim, hidden_dim, output_dim, num_layers):
    """Deterministic parameter init mirroring the PyTorch module's shapes."""
    dims = [input_dim] + [hidden_dim] * (num_layers - 1) + [output_dim]
    params = []
    for layer in range(num_layers):
        din, dout = dims[layer], dims[layer + 1]
        key, kw, kb = jax.random.split(key, 3)
        bound = 1.0 / jnp.sqrt(din)
        w = jax.random.uniform(kw, (din, dout), jnp.float32, -bound, bound)
        b = jax.random.uniform(kb, (1, dout), jnp.float32, -bound, bound)
        # BatchNorm1d (eval mode, fresh stats): mean=0, var=1, gamma=1, beta=0.
        bn_mean = jnp.zeros((1, dout), jnp.float32)
        bn_var = jnp.ones((1, dout), jnp.float32)
        bn_gamma = jnp.ones((1, dout), jnp.float32)
        bn_beta = jnp.zeros((1, dout), jnp.float32)
        params.append(dict(w=w, b=b, bn_mean=bn_mean, bn_var=bn_var,
                           bn_gamma=bn_gamma, bn_beta=bn_beta))
    return params


if __name__ == "__main__":
    # Small, deterministic synthetic graph.
    num_nodes = 32
    input_dim = 16
    hidden_dim = 32
    output_dim = 8
    num_layers = 3
    num_edges = 64

    key = jax.random.PRNGKey(0)
    key, kx, ke, kp = jax.random.split(key, 4)

    x = jax.random.normal(kx, (num_nodes, input_dim), jnp.float32)
    edge_index = jax.random.randint(ke, (2, num_edges), 0, num_nodes,
                                    dtype=jnp.int32)
    params = init_gin_params(kp, input_dim, hidden_dim, output_dim, num_layers)

    out = gin_forward(x, edge_index, params)
    out = jax.block_until_ready(out)

    assert out.shape == (num_nodes, output_dim), out.shape
    assert jnp.all(jnp.isfinite(out))
    print("KERNEL_OK")
</pallas_src>

<mosaic_0001>
module attributes {stable_mosaic.version = 11 : i64} {
  func.func @_gin_fused_kernel(%arg0: i32, %arg1: memref<128x128xbf16, #tpu.memory_space<vmem>>, %arg2: memref<128x128xf32, #tpu.memory_space<vmem>>, %arg3: memref<3x128x128xf32, #tpu.memory_space<vmem>>, %arg4: memref<3x1x128xf32, #tpu.memory_space<vmem>>, %arg5: memref<128x128xf32, #tpu.memory_space<vmem>>) attributes {dimension_semantics = [#tpu.dimension_semantics<arbitrary>], iteration_bounds = array<i64: 1>, scalar_prefetch = 0 : i64, scratch_operands = 0 : i64, tpu.core_type = #tpu.core_type<tc>, window_params = [{pipeline_mode = #tpu.pipeline_mode<synchronous>, transform_indices = @transform_0, window_bounds = array<i64: 128, 128>}, {pipeline_mode = #tpu.pipeline_mode<synchronous>, transform_indices = @transform_1, window_bounds = array<i64: 128, 128>}, {pipeline_mode = #tpu.pipeline_mode<synchronous>, transform_indices = @transform_2, window_bounds = array<i64: 3, 128, 128>}, {pipeline_mode = #tpu.pipeline_mode<synchronous>, transform_indices = @transform_3, window_bounds = array<i64: 3, 1, 128>}, {pipeline_mode = #tpu.pipeline_mode<synchronous>, transform_indices = @transform_4, window_bounds = array<i64: 128, 128>}]} {
    %c0 = arith.constant 0 : index
    %c0_0 = arith.constant 0 : index
    %0 = vector.load %arg1[%c0, %c0_0] : memref<128x128xbf16, #tpu.memory_space<vmem>>, vector<128x128xbf16>
    %c0_1 = arith.constant 0 : index
    %c0_2 = arith.constant 0 : index
    %1 = vector.load %arg2[%c0_1, %c0_2] : memref<128x128xf32, #tpu.memory_space<vmem>>, vector<128x128xf32>
    %2 = arith.truncf %1 : vector<128x128xf32> to vector<128x128xbf16>
    %cst = arith.constant dense<0.000000e+00> : vector<128x128xf32>
    %3 = tpu.matmul %0, %2, %cst {dimension_numbers = #tpu.dot_dimension_numbers<[1], [0], [0], [1], [0, 0, 1, 1], [], []>} : vector<128x128xbf16>, vector<128x128xbf16>, vector<128x128xf32> -> vector<128x128xf32>
    %cst_3 = arith.constant 1.000000e+00 : f32
    %4 = vector.broadcast %cst_3 : f32 to vector<128x128xf32>
    %5 = arith.mulf %4, %1 : vector<128x128xf32>
    %6 = arith.addf %5, %3 : vector<128x128xf32>
    %c0_4 = arith.constant 0 : index
    %c0_5 = arith.constant 0 : index
    %c0_6 = arith.constant 0 : index
    %7 = vector.load %arg3[%c0_4, %c0_5, %c0_6] : memref<3x128x128xf32, #tpu.memory_space<vmem>>, vector<1x128x128xf32>
    %8 = vector.shape_cast %7 : vector<1x128x128xf32> to vector<128x128xf32>
    %cst_7 = arith.constant dense<0.000000e+00> : vector<128x128xf32>
    %9 = tpu.matmul %6, %8, %cst_7 {dimension_numbers = #tpu.dot_dimension_numbers<[1], [0], [0], [1], [0, 0, 1, 1], [], []>} : vector<128x128xf32>, vector<128x128xf32>, vector<128x128xf32> -> vector<128x128xf32>
    %c0_8 = arith.constant 0 : index
    %c0_9 = arith.constant 0 : index
    %c0_10 = arith.constant 0 : index
    %10 = vector.load %arg4[%c0_8, %c0_9, %c0_10] : memref<3x1x128xf32, #tpu.memory_space<vmem>>, vector<1x1x128xf32>
    %11 = vector.shape_cast %10 : vector<1x1x128xf32> to vector<1x128xf32>
    %12 = vector.broadcast %11 : vector<1x128xf32> to vector<128x128xf32>
    %13 = arith.addf %9, %12 : vector<128x128xf32>
    %cst_11 = arith.constant 0.000000e+00 : f32
    %14 = vector.broadcast %cst_11 : f32 to vector<128x128xf32>
    %15 = arith.maximumf %13, %14 : vector<128x128xf32>
    %16 = arith.truncf %15 : vector<128x128xf32> to vector<128x128xbf16>
    %cst_12 = arith.constant dense<0.000000e+00> : vector<128x128xf32>
    %17 = tpu.matmul %0, %16, %cst_12 {dimension_numbers = #tpu.dot_dimension_numbers<[1], [0], [0], [1], [0, 0, 1, 1], [], []>} : vector<128x128xbf16>, vector<128x128xbf16>, vector<128x128xf32> -> vector<128x128xf32>
    %cst_13 = arith.constant 1.000000e+00 : f32
    %18 = vector.broadcast %cst_13 : f32 to vector<128x128xf32>
    %19 = arith.mulf %18, %15 : vector<128x128xf32>
    %20 = arith.addf %19, %17 : vector<128x128xf32>
    %c1 = arith.constant 1 : index
    %c0_14 = arith.constant 0 : index
    %c0_15 = arith.constant 0 : index
    %21 = vector.load %arg3[%c1, %c0_14, %c0_15] : memref<3x128x128xf32, #tpu.memory_space<vmem>>, vector<1x128x128xf32>
    %22 = vector.shape_cast %21 : vector<1x128x128xf32> to vector<128x128xf32>
    %cst_16 = arith.constant dense<0.000000e+00> : vector<128x128xf32>
    %23 = tpu.matmul %20, %22, %cst_16 {dimension_numbers = #tpu.dot_dimension_numbers<[1], [0], [0], [1], [0, 0, 1, 1], [], []>} : vector<128x128xf32>, vector<128x128xf32>, vector<128x128xf32> -> vector<128x128xf32>
    %c1_17 = arith.constant 1 : index
    %c0_18 = arith.constant 0 : index
    %c0_19 = arith.constant 0 : index
    %24 = vector.load %arg4[%c1_17, %c0_18, %c0_19] : memref<3x1x128xf32, #tpu.memory_space<vmem>>, vector<1x1x128xf32>
    %25 = vector.shape_cast %24 : vector<1x1x128xf32> to vector<1x128xf32>
    %26 = vector.broadcast %25 : vector<1x128xf32> to vector<128x128xf32>
    %27 = arith.addf %23, %26 : vector<128x128xf32>
    %cst_20 = arith.constant 0.000000e+00 : f32
    %28 = vector.broadcast %cst_20 : f32 to vector<128x128xf32>
    %29 = arith.maximumf %27, %28 : vector<128x128xf32>
    %30 = arith.truncf %29 : vector<128x128xf32> to vector<128x128xbf16>
    %cst_21 = arith.constant dense<0.000000e+00> : vector<128x128xf32>
    %31 = tpu.matmul %0, %30, %cst_21 {dimension_numbers = #tpu.dot_dimension_numbers<[1], [0], [0], [1], [0, 0, 1, 1], [], []>} : vector<128x128xbf16>, vector<128x128xbf16>, vector<128x128xf32> -> vector<128x128xf32>
    %cst_22 = arith.constant 1.000000e+00 : f32
    %32 = vector.broadcast %cst_22 : f32 to vector<128x128xf32>
    %33 = arith.mulf %32, %29 : vector<128x128xf32>
    %34 = arith.addf %33, %31 : vector<128x128xf32>
    %c2 = arith.constant 2 : index
    %c0_23 = arith.constant 0 : index
    %c0_24 = arith.constant 0 : index
    %35 = vector.load %arg3[%c2, %c0_23, %c0_24] : memref<3x128x128xf32, #tpu.memory_space<vmem>>, vector<1x128x128xf32>
    %36 = vector.shape_cast %35 : vector<1x128x128xf32> to vector<128x128xf32>
    %cst_25 = arith.constant dense<0.000000e+00> : vector<128x128xf32>
    %37 = tpu.matmul %34, %36, %cst_25 {dimension_numbers = #tpu.dot_dimension_numbers<[1], [0], [0], [1], [0, 0, 1, 1], [], []>} : vector<128x128xf32>, vector<128x128xf32>, vector<128x128xf32> -> vector<128x128xf32>
    %c2_26 = arith.constant 2 : index
    %c0_27 = arith.constant 0 : index
    %c0_28 = arith.constant 0 : index
    %38 = vector.load %arg4[%c2_26, %c0_27, %c0_28] : memref<3x1x128xf32, #tpu.memory_space<vmem>>, vector<1x1x128xf32>
    %39 = vector.shape_cast %38 : vector<1x1x128xf32> to vector<1x128xf32>
    %40 = vector.broadcast %39 : vector<1x128xf32> to vector<128x128xf32>
    %41 = arith.addf %37, %40 : vector<128x128xf32>
    %c0_29 = arith.constant 0 : index
    %c0_30 = arith.constant 0 : index
    %42 = vector.load %arg5[%c0_29, %c0_30] : memref<128x128xf32, #tpu.memory_space<vmem>>, vector<128x128xf32>
    tpu.vector_store %arg5[%c0_29, %c0_30], %41 {strides = array<i32>} : memref<128x128xf32, #tpu.memory_space<vmem>>, vector<128x128xf32>,
    return
  }
  func.func @transform_0(%arg0: i32) -> (i32, i32) {
    %c0_i32 = arith.constant 0 : i32
    %c0_i32_0 = arith.constant 0 : i32
    %c0_i32_1 = arith.constant 0 : i32
    return %c0_i32, %c0_i32_0 : i32, i32
  }
  func.func @transform_1(%arg0: i32) -> (i32, i32) {
    %c0_i32 = arith.constant 0 : i32
    %c0_i32_0 = arith.constant 0 : i32
    %c0_i32_1 = arith.constant 0 : i32
    return %c0_i32, %c0_i32_0 : i32, i32
  }
  func.func @transform_2(%arg0: i32) -> (i32, i32, i32) {
    %c0_i32 = arith.constant 0 : i32
    %c0_i32_0 = arith.constant 0 : i32
    %c0_i32_1 = arith.constant 0 : i32
    %c0_i32_2 = arith.constant 0 : i32
    return %c0_i32, %c0_i32_0, %c0_i32_1 : i32, i32, i32
  }
  func.func @transform_3(%arg0: i32) -> (i32, i32, i32) {
    %c0_i32 = arith.constant 0 : i32
    %c0_i32_0 = arith.constant 0 : i32
    %c0_i32_1 = arith.constant 0 : i32
    %c0_i32_2 = arith.constant 0 : i32
    return %c0_i32, %c0_i32_0, %c0_i32_1 : i32, i32, i32
  }
  func.func @transform_4(%arg0: i32) -> (i32, i32) {
    %c0_i32 = arith.constant 0 : i32
    %c0_i32_0 = arith.constant 0 : i32
    %c0_i32_1 = arith.constant 0 : i32
    return %c0_i32, %c0_i32_0 : i32, i32
  }
}

</mosaic_0001>

<bundles_post_ra>
// kernel: tpu_custom_call.1
= control target key start
LH: loop header
LB: loop body
LE: loop exit
PB: predicated region body
PF: predicated region fallthrough
CT: control target
= control target key end

     0   :  { %9 = vsyncpa [#allocation3], 0  ;;  %s2213_s0 = inlined_call_operand.hbm [shape: bf16[128,128], index: 0, kind: input, shape index: {}]   ;;  %s2214_s1 = inlined_call_operand.hbm [shape: f32[128,128], index: 1, kind: input, shape index: {}]   ;;  %s2215_s2 = inlined_call_operand.hbm [shape: f32[3,128,128], index: 2, kind: input, shape index: {}]   ;;  %s2216_s3 = inlined_call_operand.hbm [shape: f32[3,1,128], index: 3, kind: input, shape index: {}]   ;;  %s2217_s4 = inlined_call_operand.hbm [shape: f32[128,128], index: 4, kind: output, shape index: {}]  }
   0x1   :  { %10 = vsyncpa [#allocation6], 0 }
   0x2   :  { %11 = vsyncpa [#allocation9], 0 }
   0x3   :  { %12 = vsyncpa [#allocation4], 0  ;;  %s1744_s15 = smov [#allocation5]   ;;  %s1626_s19 = scalar_lea.hbm %s2214_s1, 2048 }
   0x4   :  { %s30_s16 = sshll.u32 %s1744_s15, 4  ;;  %p1627_p0 = scmp.ne.s32.totalorder %s2214_s1, %s1626_s19  ;;  %s31_s16 = int_to_ptr.vmem [resolvable:$true] %s30_s16 }
   0x5   :  { %p1630_p1 = scmp.lt.u32.totalorder %s1626_s19, %s2214_s1 }
   0x7   :  { %p1632_p2 = pnand %p1630_p1, %p1627_p0 }
   0x9   :  { %1635 = shalt.err (!%p1632_p2)
}
   0xa   :  { %s1636_s24 = scalar_lea.vmem %s31_s16, 2048  ;;  %p1641_p4 = scmp.lt.s32.totalorder %s31_s16, %s31_s16 }
   0xb   :  { %p1637_p3 = scmp.ne.s32.totalorder %s31_s16, %s1636_s24  ;;  %p1642_p5 = scmp.lt.s32.totalorder %s1636_s24, %s1636_s24 }
   0xd   :  { %p1643_p6 = por %p1642_p5, %p1641_p4 }
   0xf   :  { %p1644_p7 = pnand %p1643_p6, %p1637_p3 }
  0x11   :  { %1647 = shalt.err (!%p1644_p7)
}
  0x12   :  { %s1745_s25 = smov 128   ;;  %s1746_s26 = smov 8  }
  0x13   :  { %36 = dma.hbm_to_vmem [thread:$0]  %s2214_s1, 2048, %s31_s16, [#allocation6], %s1745_s25, %s1745_s25, %s1746_s26  }
  0x14   :  { %s1747_s29 = smov [#allocation2]   ;;  %s1648_s7 = scalar_lea.hbm %s2213_s0, 1024 }
  0x15   :  { %s18_s30 = sshll.u32 %s1747_s29, 4  ;;  %p1649_p8 = scmp.ne.s32.totalorder %s2213_s0, %s1648_s7  ;;  %s19_s30 = int_to_ptr.vmem [resolvable:$true] %s18_s30 }
  0x16   :  { %p1652_p9 = scmp.lt.u32.totalorder %s1648_s7, %s2213_s0 }
  0x18   :  { %p1654_p10 = pnand %p1652_p9, %p1649_p8 }
  0x1a   :  { %1657 = shalt.err (!%p1654_p10)
}
  0x1b   :  { %s1658_s12 = scalar_lea.vmem %s19_s30, 1024  ;;  %p1663_p12 = scmp.lt.s32.totalorder %s19_s30, %s19_s30 }
  0x1c   :  { %p1659_p11 = scmp.ne.s32.totalorder %s19_s30, %s1658_s12  ;;  %p1664_p13 = scmp.lt.s32.totalorder %s1658_s12, %s1658_s12 }
  0x1e   :  { %p1665_p0 = por %p1664_p13, %p1663_p12 }
  0x20   :  { %p1666_p1 = pnand %p1665_p0, %p1659_p11 }
  0x22   :  { %1669 = shalt.err (!%p1666_p1)
}
  0x23   :  { %s1748_s1 = smov 64   ;;  %s1749_s13 = smov 4  }
  0x24   :  { %24 = dma.hbm_to_vmem [thread:$0]  %s2213_s0, 1024, %s19_s30, [#allocation3], %s1748_s1, %s1748_s1, %s1749_s13  }
  0x25   :  { %s1750_s16 = smov [#allocation7]   ;;  %s1751_s18 = smov [#allocation8]  }
  0x26   :  { %s42_s17 = sshll.u32 %s1750_s16, 4  ;;  %s54_s19 = sshll.u32 %s1751_s18, 4  ;;  %s43_s17 = int_to_ptr.vmem [resolvable:$true] %s42_s17  ;;  %s1807_s19 = int_to_ptr.vmem [resolvable:$true] %s54_s19 }
  0x27   :  { %s1670_s22 = scalar_lea.hbm %s2215_s2, 6144 }
  0x28   :  { %p1671_p2 = scmp.ne.s32.totalorder %s2215_s2, %s1670_s22  ;;  %p1674_p3 = scmp.lt.u32.totalorder %s1670_s22, %s2215_s2 }
  0x2a   :  { %p1676_p4 = pnand %p1674_p3, %p1671_p2 }
  0x2c   :  { %1679 = shalt.err (!%p1676_p4)
}
  0x2d   :  { %s1680_s0 = scalar_lea.vmem %s43_s17, 6144  ;;  %p1685_p6 = scmp.lt.s32.totalorder %s43_s17, %s43_s17 }
  0x2e   :  { %p1681_p5 = scmp.ne.s32.totalorder %s43_s17, %s1680_s0  ;;  %p1686_p7 = scmp.lt.s32.totalorder %s1680_s0, %s1680_s0 }
  0x30   :  { %p1687_p8 = por %p1686_p7, %p1685_p6 }
  0x32   :  { %p1688_p9 = pnand %p1687_p8, %p1681_p5 }
  0x34   :  { %1691 = shalt.err (!%p1688_p9)
}
  0x35   :  { %48 = dma.hbm_to_vmem [thread:$0]  %s2215_s2, 6144, %s43_s17, [#allocation6], %s1745_s25, %s1745_s25, %s1746_s26  }
  0x36   :  { %s1692_s7 = scalar_lea.hbm %s2216_s3, 48 }
  0x37   :  { %p1693_p10 = scmp.ne.s32.totalorder %s2216_s3, %s1692_s7  ;;  %p1696_p11 = scmp.lt.u32.totalorder %s1692_s7, %s2216_s3 }
  0x39   :  { %p1698_p12 = pnand %p1696_p11, %p1693_p10 }
  0x3b   :  { %1701 = shalt.err (!%p1698_p12)
}
  0x3c   :  { %s1702_s12 = scalar_lea.vmem %s1807_s19, 48  ;;  %s1706_s2 = scalar_lea.vmem %s1807_s19, 64 }
  0x3d   :  { %p1703_p13 = scmp.ne.s32.totalorder %s1807_s19, %s1702_s12  ;;  %p1707_p0 = scmp.lt.s32.totalorder %s1807_s19, %s1807_s19 }
  0x3e   :  { %p1708_p1 = scmp.lt.s32.totalorder %s1706_s2, %s1702_s12 }
  0x40   :  { %p1709_p2 = por %p1708_p1, %p1707_p0 }
  0x42   :  { %p1710_p3 = pnand %p1709_p2, %p1703_p13 }
  0x44   :  { %1713 = shalt.err (!%p1710_p3)
}
  0x45   :  { %s1752_s1 = smov 16   ;;  %s1753_s13 = smov 1  }
  0x46   :  { %60 = dma.hbm_to_vmem [thread:$0]  %s2216_s3, 48, %s1807_s19, [#allocation9], %s1752_s1, %s1752_s1, %s1753_s13  }
  0x47   :  { %1736 = dma.done.wait [#allocation3], 1024  }
  0x48   :  { %1737 = vsyncadd [#allocation3], 4294966272 }
  0x49   :  { %1738 = dma.done.wait [#allocation6], 8192  }
  0x4a   :  { %1739 = vsyncadd [#allocation6], 4294959104 }
  0x4b   :  { %1740 = dma.done.wait [#allocation9], 48  }
  0x4c   :  { %1741 = vsyncadd [#allocation9], 4294967248  ;;  %v1842_v0 = vld [vmem:[#allocation5] sm:$0xff]  ;;  %v1844_v1 = vld [vmem:[#allocation5 + $0x8] sm:$0xff]  ;;  %s1754_s3 = smov [#allocation10]  }
  0x4d   :  { %v1846_v2 = vld [vmem:[#allocation5 + $0x10] sm:$0xff]  ;;  %v106_v3 = vpack.c.bf16 %v1844_v1, %v1842_v0  ;;  %v1850_v4 = vld [vmem:[#allocation5 + $0x18] sm:$0xff]  ;;  %v1854_v6 = vld [vmem:[#allocation5 + $0x20] sm:$0xff]  ;;  %s1078_s16 = sshll.u32 %s1754_s3, 4  ;;  %s1079_s16 = int_to_ptr.vmem [resolvable:$true] %s1078_s16 }
  0x4e   :  { %v107_v5 = vpack.c.bf16 %v1850_v4, %v1846_v2  ;;  %v1856_v7 = vld [vmem:[#allocation5 + $0x28] sm:$0xff]  ;;  %v1858_v8 = vld [vmem:[#allocation5 + $0x30] sm:$0xff]  ;;  %v1862_v10 = vld [vmem:[#allocation5 + $0x38] sm:$0xff]  ;;  %s1714_s17 = scalar_lea.vmem %s1079_s16, 2048  ;;  %p1719_p5 = scmp.lt.s32.totalorder %s1079_s16, %s1079_s16 }
  0x4f   :  { %1247 = vmatprep.subr.bf16.mxu0 %v106_v3  ;;  %v108_v9 = vpack.c.bf16 %v1856_v7, %v1854_v6  ;;  %v1864_v11 = vld [vmem:[#allocation2] sm:$0xff]   ;;  %v109_v12 = vpack.c.bf16 %v1862_v10, %v1858_v8  ;;  %v1871_v14 = vld [vmem:[#allocation5 + $0x48] sm:$0xff]  ;;  %v1875_v16 = vld [vmem:[#allocation5 + $0x50] sm:$0xff]  ;;  %p1715_p4 = scmp.ne.s32.totalorder %s1079_s16, %s1714_s17  ;;  %p1720_p6 = scmp.lt.s32.totalorder %s1714_s17, %s1714_s17 }
  0x50   :  { %1248 = vmatpush3.bf16.msra.mxu0 %v106_v3  ;;  %1263 = vmatprep.mubr.bf16.mxu0 %v1864_v11  ;;  %v1869_v13 = vld [vmem:[#allocation5 + $0x40] sm:$0xff]  ;;  %v276_v18 = vld [vmem:[#allocation7 + $0x8] sm:$0xff]  ;;  %v1877_v19 = vld [vmem:[#allocation5 + $0x58] sm:$0xff] }
  0x51   :  { %1249 = vmatprep.subr.bf16.mxu0 %v107_v5  ;;  %v110_v15 = vpack.c.bf16 %v1871_v14, %v1869_v13  ;;  %v275_v17 = vld [vmem:[#allocation7] sm:$0xff]  ;;  %v277_v21 = vld [vmem:[#allocation7 + $0x10] sm:$0xff]  ;;  %v278_v22 = vld [vmem:[#allocation7 + $0x18] sm:$0xff]  ;;  %v111_v26 = vpack.c.bf16 %v1877_v19, %v1875_v16  ;;  %p1721_p7 = por %p1720_p6, %p1719_p5 }
  0x52   :  { %v1511_v20 = vpack.c.bf16 %v276_v18, %v275_v17  ;;  %v1515_v23 = vpack.c.bf16 %v278_v22, %v277_v21  ;;  %v279_v24 = vld [vmem:[#allocation7 + $0x20] sm:$0xff]  ;;  %v280_v25 = vld [vmem:[#allocation7 + $0x28] sm:$0xff]  ;;  %v281_v30 = vld [vmem:[#allocation7 + $0x30] sm:$0xff] }
  0x53   :  { %v1881_v27 = vld [vmem:[#allocation5 + $0x60] sm:$0xff]  ;;  %v1883_v28 = vld [vmem:[#allocation5 + $0x68] sm:$0xff]  ;;  %v1519_v29 = vpack.c.bf16 %v280_v25, %v279_v24  ;;  %v282_v31 = vld [vmem:[#allocation7 + $0x38] sm:$0xff]  ;;  %p1722_p8 = pnand %p1721_p7, %p1715_p4 }
  0x54   :  { %1250 = vmatpush3.bf16.msra.mxu0 %v107_v5  ;;  %1512 = vmatprep.subr.bf16.mxu1 %v1511_v20  ;;  %v112_v32 = vpack.c.bf16 %v1883_v28, %v1881_v27  ;;  %v1887_v33 = vld [vmem:[#allocation5 + $0x70] sm:$0xff]  ;;  %v1889_v34 = vld [vmem:[#allocation5 + $0x78] sm:$0xff]  ;;  %v1523_v35 = vpack.c.bf16 %v282_v31, %v281_v30  ;;  %v283_v36 = vld [vmem:[#allocation7 + $0x40] sm:$0xff] }
  0x55   :  { %1251 = vmatprep.subr.bf16.mxu0 %v108_v9  ;;  %1514 = vmatpush3.bf16.msra.mxu1 %v1511_v20  ;;  %v284_v37 = vld [vmem:[#allocation7 + $0x48] sm:$0xff]  ;;  %v113_v38 = vpack.c.bf16 %v1889_v34, %v1887_v33  ;;  %v285_v40 = vld [vmem:[#allocation7 + $0x50] sm:$0xff]  ;;  %v286_v41 = vld [vmem:[#allocation7 + $0x58] sm:$0xff] }
  0x56   :  { %1516 = vmatprep.subr.bf16.mxu1 %v1515_v23  ;;  %v1527_v39 = vpack.c.bf16 %v284_v37, %v283_v36  ;;  %v1531_v42 = vpack.c.bf16 %v286_v41, %v285_v40  ;;  %v1893_v43 = vld [vmem:[#allocation2 + $0x8] sm:$0xff]   ;;  %v287_v44 = vld [vmem:[#allocation7 + $0x60] sm:$0xff]  ;;  %v1895_v46 = vld [vmem:[#allocation2 + $0x10] sm:$0xff]  }
  0x57   :  { %v288_v45 = vld [vmem:[#allocation7 + $0x68] sm:$0xff]  ;;  %v1899_v48 = vld [vmem:[#allocation2 + $0x18] sm:$0xff]   ;;  %v1901_v49 = vld [vmem:[#allocation2 + $0x20] sm:$0xff]  }
  0x58   :  { %1252 = vmatpush3.bf16.msra.mxu0 %v108_v9  ;;  %v1535_v47 = vpack.c.bf16 %v288_v45, %v287_v44  ;;  %v1905_v50 = vld [vmem:[#allocation2 + $0x28] sm:$0xff]   ;;  %v1907_v51 = vld [vmem:[#allocation2 + $0x30] sm:$0xff]   ;;  %v1911_v52 = vld [vmem:[#allocation2 + $0x38] sm:$0xff]  }
  0x59   :  { %1253 = vmatprep.subr.bf16.mxu0 %v109_v12  ;;  %1518 = vmatpush3.bf16.msra.mxu1 %v1515_v23  ;;  %v289_v53 = vld [vmem:[#allocation7 + $0x70] sm:$0xff]  ;;  %v290_v54 = vld [vmem:[#allocation7 + $0x78] sm:$0xff]  ;;  %v593_v44 = vld [vmem:[#allocation7 + $0xe0] sm:$0xff] }
  0x5a   :  { %1520 = vmatprep.subr.bf16.mxu1 %v1519_v29  ;;  %v1539_v55 = vpack.c.bf16 %v290_v54, %v289_v53  ;;  %v584_v31 = vld [vmem:[#allocation7 + $0x98] sm:$0xff]  ;;  %v587_v36 = vld [vmem:[#allocation7 + $0xb0] sm:$0xff]  ;;  %v594_v45 = vld [vmem:[#allocation7 + $0xe8] sm:$0xff] }
  0x5b   :  { %v588_v37 = vld [vmem:[#allocation7 + $0xb8] sm:$0xff]  ;;  %v591_v40 = vld [vmem:[#allocation7 + $0xd0] sm:$0xff]  ;;  %v1931_v53 = vld [vmem:[#allocation8] ss:$0 sm:$0xff] }
  0x5c   :  { %1254 = vmatpush3.bf16.msra.mxu0 %v109_v12  ;;  %v592_v41 = vld [vmem:[#allocation7 + $0xd8] sm:$0xff] }
  0x5d   :  { %1255 = vmatprep.subr.bf16.mxu0 %v110_v15  ;;  %1522 = vmatpush3.bf16.msra.mxu1 %v1519_v29  ;;  %v582_v29 = vld [vmem:[#allocation7 + $0x88] sm:$0xff] }
  0x5e   :  { %1524 = vmatprep.subr.bf16.mxu1 %v1523_v35 }
  0x60   :  { %1256 = vmatpush3.bf16.msra.mxu0 %v110_v15 }
  0x61   :  { %1257 = vmatprep.subr.bf16.mxu0 %v111_v26  ;;  %1526 = vmatpush3.bf16.msra.mxu1 %v1523_v35  ;;  %v586_v35 = vld [vmem:[#allocation7 + $0xa8] sm:$0xff] }
  0x62   :  { %1528 = vmatprep.subr.bf16.mxu1 %v1527_v39 }
  0x64   :  { %1258 = vmatpush3.bf16.msra.mxu0 %v111_v26 }
  0x65   :  { %1259 = vmatprep.subr.bf16.mxu0 %v112_v32  ;;  %1530 = vmatpush3.bf16.msra.mxu1 %v1527_v39 }
  0x66   :  { %1532 = vmatprep.subr.bf16.mxu1 %v1531_v42 }
  0x68   :  { %1260 = vmatpush3.bf16.msra.mxu0 %v112_v32 }
  0x69   :  { %1261 = vmatprep.subr.bf16.mxu0 %v113_v38  ;;  %1534 = vmatpush3.bf16.msra.mxu1 %v1531_v42  ;;  %v1563_v42 = vpack.c.bf16 %v592_v41, %v591_v40 }
  0x6a   :  { %1536 = vmatprep.subr.bf16.mxu1 %v1535_v47 }
  0x6c   :  { %1262 = vmatpush3.bf16.msra.mxu0 %v113_v38  ;;  %v589_v38 = vld [vmem:[#allocation7 + $0xc0] sm:$0xff] }
  0x6d   :  { %1538 = vmatpush3.bf16.msra.mxu1 %v1535_v47  ;;  %v1567_v47 = vpack.c.bf16 %v594_v45, %v593_v44 }
  0x6e   :  { %1540 = vmatprep.subr.bf16.mxu1 %v1539_v55 }
  0x6f   :  { %1264 = vmatmul.mubr.bf16.vlgmr.msra.gmra.mrb[0].mxu0 %v1893_v43 }
  0x70   :  { %1267 = vmatprep.mubr.bf16.mxu0 %v1895_v46 }
  0x71   :  { %1542 = vmatpush3.bf16.msra.mxu1 %v1539_v55 }
  0x77   :  { %1268 = vmatmul.mubr.bf16.gmra.mrb[4].mxu0 %v1899_v48 }
  0x78   :  { %1271 = vmatprep.mubr.bf16.mxu0 %v1901_v49 }
  0x7f   :  { %1272 = vmatmul.mubr.bf16.gmra.mrb[8].mxu0 %v1905_v50 }
  0x80   :  { %1275 = vmatprep.mubr.bf16.mxu0 %v1907_v51 }
  0x87   :  { %1276 = vmatmul.mubr.bf16.gmra.mrb[12].mxu0 %v1911_v52 }
  0x88   :  { %1351 = vmatprep.mubr.bf16.mxu0 %v1864_v11 }
 0x142   :  { %v1265_v56 = vpop.f32.mrb[0].mxu0 }
 0x143   :  { %v196_v57 = vpop.f32.mrb[1].mxu0  ;;  %v261_v62 = vadd.f32 %v1265_v56, %v1846_v2 }
 0x144   :  { %v1266_v58 = vpop.f32.mrb[2].mxu0  ;;  %v259_v59 = vadd.f32 %v196_v57, %v1842_v0 }
 0x145   :  { %v199_v60 = vpop.f32.mrb[3].mxu0  ;;  %v262_v63 = vadd.f32 %v1266_v58, %v1850_v4 }
 0x146   :  { %v260_v61 = vadd.f32 %v199_v60, %v1844_v1  ;;  %1311 = vmatprep.mubr.f32.mxu1 %v259_v59 }
 0x148   :  { %1312 = vmatmul.mubr.f32.vlgmr.msra.gmra.mrb[0].mxu1 %v260_v61 }
 0x149   :  { %1314 = vmatprep.mubr.f32.mxu1 %v261_v62 }
 0x14a   :  { %v1269_v3 = vpop.f32.mrb[4].mxu0 }
 0x14b   :  { %v212_v5 = vpop.f32.mrb[5].mxu0  ;;  %v265_v0 = vadd.f32 %v1269_v3, %v1858_v8 }
 0x14c   :  { %v263_v9 = vadd.f32 %v212_v5, %v1854_v6  ;;  %v1270_v12 = vpop.f32.mrb[6].mxu0  ;;  %1315 = vmatmul.mubr.f32.gmra.mrb[2].mxu1 %v262_v63 }
 0x14d   :  { %v215_v15 = vpop.f32.mrb[7].mxu0  ;;  %v266_v1 = vadd.f32 %v1270_v12, %v1862_v10 }
 0x14e   :  { %v264_v17 = vadd.f32 %v215_v15, %v1856_v7  ;;  %1317 = vmatprep.mubr.f32.mxu1 %v263_v9 }
 0x150   :  { %1318 = vmatmul.mubr.f32.gmra.mrb[4].mxu1 %v264_v17 }
 0x151   :  { %1320 = vmatprep.mubr.f32.mxu1 %v265_v0 }
 0x152   :  { %v1273_v2 = vpop.f32.mrb[8].mxu0 }
 0x153   :  { %v228_v18 = vpop.f32.mrb[9].mxu0  ;;  %v269_v22 = vadd.f32 %v1273_v2, %v1875_v16  ;;  %v581_v16 = vld [vmem:[#allocation7 + $0x80] sm:$0xff] }
 0x154   :  { %v267_v4 = vadd.f32 %v228_v18, %v1869_v13  ;;  %v1274_v20 = vpop.f32.mrb[10].mxu0  ;;  %1321 = vmatmul.mubr.f32.gmra.mrb[6].mxu1 %v266_v1  ;;  %v1543_v30 = vpack.c.bf16 %v582_v29, %v581_v16 }
 0x155   :  { %v231_v21 = vpop.f32.mrb[11].mxu0  ;;  %v270_v7 = vadd.f32 %v1274_v20, %v1877_v19  ;;  %v583_v19 = vld [vmem:[#allocation7 + $0x90] sm:$0xff] }
 0x156   :  { %v268_v6 = vadd.f32 %v231_v21, %v1871_v14  ;;  %1323 = vmatprep.mubr.f32.mxu1 %v267_v4  ;;  %v1547_v32 = vpack.c.bf16 %v584_v31, %v583_v19  ;;  %1544 = vmatprep.subr.bf16.mxu1 %v1543_v30 }
 0x157   :  { %1546 = vmatpush3.bf16.msra.mxu1 %v1543_v30 }
 0x158   :  { %1324 = vmatmul.mubr.f32.gmra.mrb[8].mxu1 %v268_v6  ;;  %1548 = vmatprep.subr.bf16.mxu1 %v1547_v32 }
 0x159   :  { %1326 = vmatprep.mubr.f32.mxu1 %v269_v22 }
 0x15a   :  { %v1277_v8 = vpop.f32.mrb[12].mxu0 }
 0x15b   :  { %v244_v23 = vpop.f32.mrb[13].mxu0  ;;  %v273_v26 = vadd.f32 %v1277_v8, %v1887_v33  ;;  %1550 = vmatpush3.bf16.msra.mxu1 %v1547_v32  ;;  %v1555_v33 = vpack.c.bf16 %v588_v37, %v587_v36 }
 0x15c   :  { %v271_v10 = vadd.f32 %v244_v23, %v1881_v27  ;;  %v1278_v24 = vpop.f32.mrb[14].mxu0  ;;  %1327 = vmatmul.mubr.f32.gmra.mrb[10].mxu1 %v270_v7  ;;  %v585_v27 = vld [vmem:[#allocation7 + $0xa0] sm:$0xff] }
 0x15d   :  { %v247_v25 = vpop.f32.mrb[15].mxu0  ;;  %v274_v14 = vadd.f32 %v1278_v24, %v1889_v34  ;;  %v590_v34 = vld [vmem:[#allocation7 + $0xc8] sm:$0xff] }
 0x15e   :  { %v272_v13 = vadd.f32 %v247_v25, %v1883_v28  ;;  %1329 = vmatprep.mubr.f32.mxu1 %v271_v10  ;;  %v1551_v28 = vpack.c.bf16 %v586_v35, %v585_v27  ;;  %v1559_v39 = vpack.c.bf16 %v590_v34, %v589_v38 }
 0x160   :  { %1330 = vmatmul.mubr.f32.gmra.mrb[12].mxu1 %v272_v13  ;;  %1552 = vmatprep.subr.bf16.mxu1 %v1551_v28 }
 0x161   :  { %1332 = vmatprep.mubr.f32.mxu1 %v273_v26  ;;  %1554 = vmatpush3.bf16.msra.mxu1 %v1551_v28 }
 0x162   :  { %1556 = vmatprep.subr.bf16.mxu1 %v1555_v33 }
 0x164   :  { %1333 = vmatmul.mubr.f32.gmra.mrb[14].mxu1 %v274_v14 }
 0x165   :  { %1558 = vmatpush3.bf16.msra.mxu1 %v1555_v33 }
 0x166   :  { %1560 = vmatprep.subr.bf16.mxu1 %v1559_v39 }
 0x169   :  { %1562 = vmatpush3.bf16.msra.mxu1 %v1559_v39 }
 0x16a   :  { %1564 = vmatprep.subr.bf16.mxu1 %v1563_v42 }
 0x16d   :  { %1566 = vmatpush3.bf16.msra.mxu1 %v1563_v42 }
 0x16e   :  { %1568 = vmatprep.subr.bf16.mxu1 %v1567_v47 }
 0x171   :  { %1570 = vmatpush3.bf16.msra.mxu1 %v1567_v47 }
 0x21b   :  { %v1313_v54 = vpop.f32.mrb[0].mxu1 }
 0x21c   :  { %v1934_v55 = vadd.f32 %v1313_v54, %v1931_v53  ;;  %v364_v56 = vpop.f32.mrb[1].mxu1 }
 0x21d   :  { %v1937_v57 = vadd.f32 %v1931_v53, %v364_v56  ;;  %v596_v56 = vld [vmem:[#allocation7 + $0xf8] sm:$0xff] }
 0x21e   :  { %v444_v58 = vmax.f32 %v1934_v55, 0.0 }
 0x21f   :  { %v443_v59 = vmax.f32 %v1937_v57, 0.0  ;;  %v1316_v60 = vpop.f32.mrb[2].mxu1 }
 0x220   :  { %v1942_v61 = vadd.f32 %v1316_v60, %v1931_v53  ;;  %v374_v62 = vpop.f32.mrb[3].mxu1 }
 0x221   :  { %v459_v63 = vpack.c.bf16 %v444_v58, %v443_v59  ;;  %v1949_v3 = vadd.f32 %v1931_v53, %v374_v62 }
 0x222   :  { %v446_v5 = vmax.f32 %v1942_v61, 0.0 }
 0x223   :  { %v445_v9 = vmax.f32 %v1949_v3, 0.0  ;;  %v1319_v12 = vpop.f32.mrb[4].mxu1  ;;  %1335 = vmatprep.subr.bf16.mxu0 %v459_v63 }
 0x224   :  { %v1954_v15 = vadd.f32 %v1319_v12, %v1931_v53  ;;  %v384_v17 = vpop.f32.mrb[5].mxu1  ;;  %1336 = vmatpush3.bf16.msra.mxu0 %v459_v63 }
 0x225   :  { %v460_v0 = vpack.c.bf16 %v446_v5, %v445_v9  ;;  %v1961_v1 = vadd.f32 %v1931_v53, %v384_v17 }
 0x226   :  { %v448_v2 = vmax.f32 %v1954_v15, 0.0 }
 0x227   :  { %v447_v18 = vmax.f32 %v1961_v1, 0.0  ;;  %v1322_v4 = vpop.f32.mrb[6].mxu1  ;;  %1337 = vmatprep.subr.bf16.mxu0 %v460_v0 }
 0x228   :  { %v1966_v20 = vadd.f32 %v1322_v4, %v1931_v53  ;;  %v394_v21 = vpop.f32.mrb[7].mxu1  ;;  %1338 = vmatpush3.bf16.msra.mxu0 %v460_v0 }
 0x229   :  { %v461_v6 = vpack.c.bf16 %v448_v2, %v447_v18  ;;  %v1973_v22 = vadd.f32 %v1931_v53, %v394_v21 }
 0x22a   :  { %v450_v7 = vmax.f32 %v1966_v20, 0.0 }
 0x22b   :  { %v449_v8 = vmax.f32 %v1973_v22, 0.0  ;;  %v1325_v23 = vpop.f32.mrb[8].mxu1  ;;  %1339 = vmatprep.subr.bf16.mxu0 %v461_v6 }
 0x22c   :  { %v1978_v10 = vadd.f32 %v1325_v23, %v1931_v53  ;;  %v404_v24 = vpop.f32.mrb[9].mxu1  ;;  %1340 = vmatpush3.bf16.msra.mxu0 %v461_v6 }
 0x22d   :  { %v462_v25 = vpack.c.bf16 %v450_v7, %v449_v8  ;;  %v1985_v13 = vadd.f32 %v1931_v53, %v404_v24 }
 0x22e   :  { %v452_v26 = vmax.f32 %v1978_v10, 0.0 }
 0x22f   :  { %v451_v14 = vmax.f32 %v1985_v13, 0.0  ;;  %v1328_v16 = vpop.f32.mrb[10].mxu1  ;;  %1341 = vmatprep.subr.bf16.mxu0 %v462_v25 }
 0x230   :  { %v1990_v29 = vadd.f32 %v1328_v16, %v1931_v53  ;;  %v414_v19 = vpop.f32.mrb[11].mxu1  ;;  %1342 = vmatpush3.bf16.msra.mxu0 %v462_v25  ;;  %v888_v16 = vld [vmem:[#allocation7 + $0x100] sm:$0xff] }
 0x231   :  { %v463_v30 = vpack.c.bf16 %v452_v26, %v451_v14  ;;  %v1997_v31 = vadd.f32 %v1931_v53, %v414_v19  ;;  %v890_v19 = vld [vmem:[#allocation7 + $0x110] sm:$0xff] }
 0x232   :  { %v454_v32 = vmax.f32 %v1990_v29, 0.0  ;;  %v889_v29 = vld [vmem:[#allocation7 + $0x108] sm:$0xff] }
 0x233   :  { %v453_v27 = vmax.f32 %v1997_v31, 0.0  ;;  %v1331_v35 = vpop.f32.mrb[12].mxu1  ;;  %1343 = vmatprep.subr.bf16.mxu0 %v463_v30  ;;  %v891_v31 = vld [vmem:[#allocation7 + $0x118] sm:$0xff] }
 0x234   :  { %v2002_v28 = vadd.f32 %v1331_v35, %v1931_v53  ;;  %v424_v36 = vpop.f32.mrb[13].mxu1  ;;  %1344 = vmatpush3.bf16.msra.mxu0 %v463_v30  ;;  %v1575_v30 = vpack.c.bf16 %v889_v29, %v888_v16  ;;  %v893_v35 = vld [vmem:[#allocation7 + $0x128] sm:$0xff] }
 0x235   :  { %v464_v37 = vpack.c.bf16 %v454_v32, %v453_v27  ;;  %v2009_v33 = vadd.f32 %v1931_v53, %v424_v36  ;;  %v894_v36 = vld [vmem:[#allocation7 + $0x130] sm:$0xff] }
 0x236   :  { %v456_v38 = vmax.f32 %v2002_v28, 0.0 }
 0x237   :  { %v455_v34 = vmax.f32 %v2009_v33, 0.0  ;;  %v1334_v39 = vpop.f32.mrb[14].mxu1  ;;  %1345 = vmatprep.subr.bf16.mxu0 %v464_v37 }
 0x238   :  { %v2014_v40 = vadd.f32 %v1334_v39, %v1931_v53  ;;  %v434_v41 = vpop.f32.mrb[15].mxu1  ;;  %1346 = vmatpush3.bf16.msra.mxu0 %v464_v37  ;;  %v895_v37 = vld [vmem:[#allocation7 + $0x138] sm:$0xff] }
 0x239   :  { %v465_v42 = vpack.c.bf16 %v456_v38, %v455_v34  ;;  %v2021_v44 = vadd.f32 %v1931_v53, %v434_v41  ;;  %v595_v53 = vld [vmem:[#allocation7 + $0xf0] sm:$0xff]  ;;  %v1587_v33 = vpack.c.bf16 %v895_v37, %v894_v36  ;;  %v899_v41 = vld [vmem:[#allocation7 + $0x158] sm:$0xff] }
 0x23a   :  { %v458_v45 = vmax.f32 %v2014_v40, 0.0  ;;  %v1571_v60 = vpack.c.bf16 %v596_v56, %v595_v53  ;;  %v898_v40 = vld [vmem:[#allocation7 + $0x150] sm:$0xff] }
 0x23b   :  { %v457_v47 = vmax.f32 %v2021_v44, 0.0  ;;  %1347 = vmatprep.subr.bf16.mxu0 %v465_v42  ;;  %v900_v44 = vld [vmem:[#allocation7 + $0x160] sm:$0xff] }
 0x23c   :  { %1348 = vmatpush3.bf16.msra.mxu0 %v465_v42  ;;  %1572 = vmatprep.subr.bf16.mxu1 %v1571_v60  ;;  %v1595_v42 = vpack.c.bf16 %v899_v41, %v898_v40 }
 0x23d   :  { %v466_v54 = vpack.c.bf16 %v458_v45, %v457_v47  ;;  %1574 = vmatpush3.bf16.msra.mxu1 %v1571_v60 }
 0x23e   :  { %1576 = vmatprep.subr.bf16.mxu1 %v1575_v30 }
 0x23f   :  { %1349 = vmatprep.subr.bf16.mxu0 %v466_v54 }
 0x240   :  { %1350 = vmatpush3.bf16.msra.mxu0 %v466_v54  ;;  %v2065_v54 = vld [vmem:[#allocation8 + $0x1] ss:$0 sm:$0xff] }
 0x243   :  { %1352 = vmatmul.mubr.bf16.vlgmr.msra.gmra.mrb[16].mxu0 %v1893_v43 }
 0x244   :  { %1355 = vmatprep.mubr.bf16.mxu0 %v1895_v46 }
 0x24b   :  { %1356 = vmatmul.mubr.bf16.gmra.mrb[20].mxu0 %v1899_v48 }
 0x24c   :  { %1359 = vmatprep.mubr.bf16.mxu0 %v1901_v49 }
 0x253   :  { %1360 = vmatmul.mubr.bf16.gmra.mrb[24].mxu0 %v1905_v50 }
 0x254   :  { %1363 = vmatprep.mubr.bf16.mxu0 %v1907_v51 }
 0x25b   :  { %1364 = vmatmul.mubr.bf16.gmra.mrb[28].mxu0 %v1911_v52 }
 0x25c   :  { %1439 = vmatprep.mubr.bf16.mxu0 %v1864_v11 }
 0x316   :  { %v1353_v62 = vpop.f32.mrb[16].mxu0 }
 0x317   :  { %v501_v63 = vpop.f32.mrb[17].mxu0  ;;  %v566_v21 = vadd.f32 %v1353_v62, %v445_v9 }
 0x318   :  { %v564_v12 = vadd.f32 %v501_v63, %v443_v59  ;;  %v1354_v17 = vpop.f32.mrb[18].mxu0 }
 0x319   :  { %v504_v0 = vpop.f32.mrb[19].mxu0  ;;  %v567_v11 = vadd.f32 %v1354_v17, %v446_v5 }
 0x31a   :  { %v565_v4 = vadd.f32 %v504_v0, %v444_v58  ;;  %1399 = vmatprep.mubr.f32.mxu1 %v564_v12 }
 0x31c   :  { %1400 = vmatmul.mubr.f32.vlgmr.msra.gmra.mrb[16].mxu1 %v565_v4 }
 0x31d   :  { %1402 = vmatprep.mubr.f32.mxu1 %v566_v21  ;;  %1578 = vmatpush3.bf16.msra.mxu1 %v1575_v30 }
 0x31e   :  { %v1357_v6 = vpop.f32.mrb[20].mxu0 }
 0x31f   :  { %v517_v23 = vpop.f32.mrb[21].mxu0  ;;  %v570_v58 = vadd.f32 %v1357_v6, %v449_v8 }
 0x320   :  { %v568_v57 = vadd.f32 %v517_v23, %v447_v18  ;;  %v1358_v59 = vpop.f32.mrb[22].mxu0  ;;  %1403 = vmatmul.mubr.f32.gmra.mrb[18].mxu1 %v567_v11 }
 0x321   :  { %v520_v24 = vpop.f32.mrb[23].mxu0  ;;  %v571_v61 = vadd.f32 %v1358_v59, %v450_v7 }
 0x322   :  { %v569_v55 = vadd.f32 %v520_v24, %v448_v2  ;;  %1405 = vmatprep.mubr.f32.mxu1 %v568_v57 }
 0x324   :  { %1406 = vmatmul.mubr.f32.gmra.mrb[20].mxu1 %v569_v55 }
 0x325   :  { %1408 = vmatprep.mubr.f32.mxu1 %v570_v58 }
 0x326   :  { %v1361_v3 = vpop.f32.mrb[24].mxu0 }
 0x327   :  { %v533_v5 = vpop.f32.mrb[25].mxu0  ;;  %v574_v2 = vadd.f32 %v1361_v3, %v453_v27  ;;  %v892_v27 = vld [vmem:[#allocation7 + $0x120] sm:$0xff] }
 0x328   :  { %v572_v9 = vadd.f32 %v533_v5, %v451_v14  ;;  %v1362_v1 = vpop.f32.mrb[26].mxu0  ;;  %1409 = vmatmul.mubr.f32.gmra.mrb[22].mxu1 %v571_v61  ;;  %v1583_v28 = vpack.c.bf16 %v893_v35, %v892_v27 }
 0x329   :  { %v536_v18 = vpop.f32.mrb[27].mxu0  ;;  %v575_v20 = vadd.f32 %v1362_v1, %v454_v32  ;;  %v1579_v32 = vpack.c.bf16 %v891_v31, %v890_v19 }
 0x32a   :  { %v573_v15 = vadd.f32 %v536_v18, %v452_v26  ;;  %1411 = vmatprep.mubr.f32.mxu1 %v572_v9 }
 0x32b   :  { %1580 = vmatprep.subr.bf16.mxu1 %v1579_v32 }
 0x32c   :  { %1412 = vmatmul.mubr.f32.gmra.mrb[24].mxu1 %v573_v15 }
 0x32d   :  { %1414 = vmatprep.mubr.f32.mxu1 %v574_v2  ;;  %1582 = vmatpush3.bf16.msra.mxu1 %v1579_v32 }
 0x32e   :  { %v1365_v22 = vpop.f32.mrb[28].mxu0  ;;  %1584 = vmatprep.subr.bf16.mxu1 %v1583_v28 }
 0x32f   :  { %v549_v7 = vpop.f32.mrb[29].mxu0  ;;  %v578_v26 = vadd.f32 %v1365_v22, %v457_v47 }
 0x330   :  { %v576_v8 = vadd.f32 %v549_v7, %v455_v34  ;;  %v1366_v25 = vpop.f32.mrb[30].mxu0  ;;  %1415 = vmatmul.mubr.f32.gmra.mrb[26].mxu1 %v575_v20  ;;  %v897_v34 = vld [vmem:[#allocation7 + $0x148] sm:$0xff] }
 0x331   :  { %v552_v13 = vpop.f32.mrb[31].mxu0  ;;  %v579_v14 = vadd.f32 %v1366_v25, %v458_v45  ;;  %1586 = vmatpush3.bf16.msra.mxu1 %v1583_v28  ;;  %v901_v45 = vld [vmem:[#allocation7 + $0x168] sm:$0xff] }
 0x332   :  { %v577_v10 = vadd.f32 %v552_v13, %v456_v38  ;;  %1417 = vmatprep.mubr.f32.mxu1 %v576_v8  ;;  %v896_v38 = vld [vmem:[#allocation7 + $0x140] sm:$0xff]  ;;  %1588 = vmatprep.subr.bf16.mxu1 %v1587_v33  ;;  %v1599_v47 = vpack.c.bf16 %v901_v45, %v900_v44 }
 0x333   :  { %v1591_v39 = vpack.c.bf16 %v897_v34, %v896_v38 }
 0x334   :  { %1418 = vmatmul.mubr.f32.gmra.mrb[28].mxu1 %v577_v10 }
 0x335   :  { %1420 = vmatprep.mubr.f32.mxu1 %v578_v26  ;;  %1590 = vmatpush3.bf16.msra.mxu1 %v1587_v33 }
 0x336   :  { %1592 = vmatprep.subr.bf16.mxu1 %v1591_v39 }
 0x338   :  { %1421 = vmatmul.mubr.f32.gmra.mrb[30].mxu1 %v579_v14 }
 0x339   :  { %1594 = vmatpush3.bf16.msra.mxu1 %v1591_v39 }
 0x33a   :  { %1596 = vmatprep.subr.bf16.mxu1 %v1595_v42 }
 0x33d   :  { %1598 = vmatpush3.bf16.msra.mxu1 %v1595_v42 }
 0x33e   :  { %1600 = vmatprep.subr.bf16.mxu1 %v1599_v47 }
 0x341   :  { %1602 = vmatpush3.bf16.msra.mxu1 %v1599_v47 }
 0x3ef   :  { %v1401_v53 = vpop.f32.mrb[16].mxu1 }
 0x3f0   :  { %v2068_v56 = vadd.f32 %v1401_v53, %v2065_v54  ;;  %v671_v60 = vpop.f32.mrb[17].mxu1  ;;  %v903_v53 = vld [vmem:[#allocation7 + $0x178] sm:$0xff] }
 0x3f1   :  { %v2071_v62 = vadd.f32 %v2065_v54, %v671_v60 }
 0x3f2   :  { %v751_v63 = vmax.f32 %v2068_v56, 0.0 }
 0x3f3   :  { %v750_v12 = vmax.f32 %v2071_v62, 0.0  ;;  %v1404_v17 = vpop.f32.mrb[18].mxu1 }
 0x3f4   :  { %v2076_v0 = vadd.f32 %v1404_v17, %v2065_v54  ;;  %v681_v4 = vpop.f32.mrb[19].mxu1 }
 0x3f5   :  { %v766_v21 = vpack.c.bf16 %v751_v63, %v750_v12  ;;  %v2083_v11 = vadd.f32 %v2065_v54, %v681_v4 }
 0x3f6   :  { %v753_v6 = vmax.f32 %v2076_v0, 0.0 }
 0x3f7   :  { %v752_v23 = vmax.f32 %v2083_v11, 0.0  ;;  %v1407_v57 = vpop.f32.mrb[20].mxu1  ;;  %1423 = vmatprep.subr.bf16.mxu0 %v766_v21 }
 0x3f8   :  { %v2088_v59 = vadd.f32 %v1407_v57, %v2065_v54  ;;  %v691_v24 = vpop.f32.mrb[21].mxu1  ;;  %1424 = vmatpush3.bf16.msra.mxu0 %v766_v21 }
 0x3f9   :  { %v767_v55 = vpack.c.bf16 %v753_v6, %v752_v23  ;;  %v2095_v58 = vadd.f32 %v2065_v54, %v691_v24 }
 0x3fa   :  { %v755_v61 = vmax.f32 %v2088_v59, 0.0 }
 0x3fb   :  { %v754_v3 = vmax.f32 %v2095_v58, 0.0  ;;  %v1410_v5 = vpop.f32.mrb[22].mxu1  ;;  %1425 = vmatprep.subr.bf16.mxu0 %v767_v55 }
 0x3fc   :  { %v2100_v9 = vadd.f32 %v1410_v5, %v2065_v54  ;;  %v701_v1 = vpop.f32.mrb[23].mxu1  ;;  %1426 = vmatpush3.bf16.msra.mxu0 %v767_v55 }
 0x3fd   :  { %v768_v18 = vpack.c.bf16 %v755_v61, %v754_v3  ;;  %v2107_v15 = vadd.f32 %v2065_v54, %v701_v1 }
 0x3fe   :  { %v757_v2 = vmax.f32 %v2100_v9, 0.0 }
 0x3ff   :  { %v756_v20 = vmax.f32 %v2107_v15, 0.0  ;;  %v1413_v22 = vpop.f32.mrb[24].mxu1  ;;  %1427 = vmatprep.subr.bf16.mxu0 %v768_v18 }
 0x400   :  { %v2112_v7 = vadd.f32 %v1413_v22, %v2065_v54  ;;  %v711_v8 = vpop.f32.mrb[25].mxu1  ;;  %1428 = vmatpush3.bf16.msra.mxu0 %v768_v18  ;;  %v1102_v22 = vld [vmem:[#allocation8 + $0x2] ss:$0 sm:$0xff] }
 0x401   :  { %v769_v25 = vpack.c.bf16 %v757_v2, %v756_v20  ;;  %v2119_v13 = vadd.f32 %v2065_v54, %v711_v8 }
 0x402   :  { %v759_v10 = vmax.f32 %v2112_v7, 0.0 }
 0x403   :  { %v758_v26 = vmax.f32 %v2119_v13, 0.0  ;;  %v1416_v14 = vpop.f32.mrb[26].mxu1  ;;  %1429 = vmatprep.subr.bf16.mxu0 %v769_v25 }
 0x404   :  { %v2124_v16 = vadd.f32 %v1416_v14, %v2065_v54  ;;  %v721_v29 = vpop.f32.mrb[27].mxu1  ;;  %1430 = vmatpush3.bf16.msra.mxu0 %v769_v25 }
 0x405   :  { %v770_v19 = vpack.c.bf16 %v759_v10, %v758_v26  ;;  %v2131_v30 = vadd.f32 %v2065_v54, %v721_v29 }
 0x406   :  { %v761_v31 = vmax.f32 %v2124_v16, 0.0 }
 0x407   :  { %v760_v32 = vmax.f32 %v2131_v30, 0.0  ;;  %v1419_v27 = vpop.f32.mrb[28].mxu1  ;;  %1431 = vmatprep.subr.bf16.mxu0 %v770_v19 }
 0x408   :  { %v2136_v35 = vadd.f32 %v1419_v27, %v2065_v54  ;;  %v731_v28 = vpop.f32.mrb[29].mxu1  ;;  %1432 = vmatpush3.bf16.msra.mxu0 %v770_v19 }
 0x409   :  { %v771_v36 = vpack.c.bf16 %v761_v31, %v760_v32  ;;  %v2143_v37 = vadd.f32 %v2065_v54, %v731_v28 }
 0x40a   :  { %v763_v33 = vmax.f32 %v2136_v35, 0.0 }
 0x40b   :  { %v762_v38 = vmax.f32 %v2143_v37, 0.0  ;;  %v1422_v34 = vpop.f32.mrb[30].mxu1  ;;  %1433 = vmatprep.subr.bf16.mxu0 %v771_v36 }
 0x40c   :  { %v2148_v39 = vadd.f32 %v1422_v34, %v2065_v54  ;;  %v741_v40 = vpop.f32.mrb[31].mxu1  ;;  %1434 = vmatpush3.bf16.msra.mxu0 %v771_v36 }
 0x40d   :  { %v772_v41 = vpack.c.bf16 %v763_v33, %v762_v38  ;;  %v2155_v42 = vadd.f32 %v2065_v54, %v741_v40  ;;  %v902_v54 = vld [vmem:[#allocation7 + $0x170] sm:$0xff] }
 0x40e   :  { %v765_v44 = vmax.f32 %v2148_v39, 0.0  ;;  %v1603_v60 = vpack.c.bf16 %v903_v53, %v902_v54 }
 0x40f   :  { %v764_v45 = vmax.f32 %v2155_v42, 0.0  ;;  %1435 = vmatprep.subr.bf16.mxu0 %v772_v41 }
 0x410   :  { %1436 = vmatpush3.bf16.msra.mxu0 %v772_v41  ;;  %1604 = vmatprep.subr.bf16.mxu1 %v1603_v60 }
 0x411   :  { %v773_v47 = vpack.c.bf16 %v765_v44, %v764_v45  ;;  %1606 = vmatpush3.bf16.msra.mxu1 %v1603_v60 }
 0x413   :  { %1437 = vmatprep.subr.bf16.mxu0 %v773_v47 }
 0x414   :  { %1438 = vmatpush3.bf16.msra.mxu0 %v773_v47 }
 0x417   :  { %1440 = vmatmul.mubr.bf16.vlgmr.msra.gmra.mrb[32].mxu0 %v1893_v43 }
 0x418   :  { %1443 = vmatprep.mubr.bf16.mxu0 %v1895_v46 }
 0x41f   :  { %1444 = vmatmul.mubr.bf16.gmra.mrb[36].mxu0 %v1899_v48 }
 0x420   :  { %1447 = vmatprep.mubr.bf16.mxu0 %v1901_v49 }
 0x427   :  { %1448 = vmatmul.mubr.bf16.gmra.mrb[40].mxu0 %v1905_v50 }
 0x428   :  { %1451 = vmatprep.mubr.bf16.mxu0 %v1907_v51 }
 0x42f   :  { %1452 = vmatmul.mubr.bf16.gmra.mrb[44].mxu0 %v1911_v52 }
 0x4ea   :  { %v1441_v17 = vpop.f32.mrb[32].mxu0 }
 0x4eb   :  { %v808_v4 = vpop.f32.mrb[33].mxu0  ;;  %v873_v50 = vadd.f32 %v1441_v17, %v752_v23 }
 0x4ec   :  { %v871_v43 = vadd.f32 %v808_v4, %v750_v12  ;;  %v1442_v46 = vpop.f32.mrb[34].mxu0 }
 0x4ed   :  { %v811_v48 = vpop.f32.mrb[35].mxu0  ;;  %v874_v51 = vadd.f32 %v1442_v46, %v753_v6 }
 0x4ee   :  { %v872_v49 = vadd.f32 %v811_v48, %v751_v63  ;;  %1487 = vmatprep.mubr.f32.mxu1 %v871_v43 }
 0x4f0   :  { %1488 = vmatmul.mubr.f32.vlgmr.msra.gmra.mrb[32].mxu1 %v872_v49 }
 0x4f1   :  { %1490 = vmatprep.mubr.f32.mxu1 %v873_v50 }
 0x4f2   :  { %v1445_v52 = vpop.f32.mrb[36].mxu0 }
 0x4f3   :  { %v824_v21 = vpop.f32.mrb[37].mxu0  ;;  %v877_v63 = vadd.f32 %v1445_v52, %v756_v20 }
 0x4f4   :  { %v875_v62 = vadd.f32 %v824_v21, %v754_v3  ;;  %v1446_v12 = vpop.f32.mrb[38].mxu0  ;;  %1491 = vmatmul.mubr.f32.gmra.mrb[34].mxu1 %v874_v51 }
 0x4f5   :  { %v827_v57 = vpop.f32.mrb[39].mxu0  ;;  %v878_v0 = vadd.f32 %v1446_v12, %v757_v2 }
 0x4f6   :  { %v876_v56 = vadd.f32 %v827_v57, %v755_v61  ;;  %1493 = vmatprep.mubr.f32.mxu1 %v875_v62 }
 0x4f8   :  { %1494 = vmatmul.mubr.f32.gmra.mrb[36].mxu1 %v876_v56 }
 0x4f9   :  { %1496 = vmatprep.mubr.f32.mxu1 %v877_v63 }
 0x4fa   :  { %v1449_v11 = vpop.f32.mrb[40].mxu0 }
 0x4fb   :  { %v840_v6 = vpop.f32.mrb[41].mxu0  ;;  %v881_v58 = vadd.f32 %v1449_v11, %v760_v32 }
 0x4fc   :  { %v879_v23 = vadd.f32 %v840_v6, %v758_v26  ;;  %v1450_v24 = vpop.f32.mrb[42].mxu0  ;;  %1497 = vmatmul.mubr.f32.gmra.mrb[38].mxu1 %v878_v0 }
 0x4fd   :  { %v843_v55 = vpop.f32.mrb[43].mxu0  ;;  %v882_v61 = vadd.f32 %v1450_v24, %v761_v31 }
 0x4fe   :  { %v880_v59 = vadd.f32 %v843_v55, %v759_v10  ;;  %1499 = vmatprep.mubr.f32.mxu1 %v879_v23 }
 0x500   :  { %1500 = vmatmul.mubr.f32.gmra.mrb[40].mxu1 %v880_v59 }
 0x501   :  { %1502 = vmatprep.mubr.f32.mxu1 %v881_v58 }
 0x502   :  { %v1453_v3 = vpop.f32.mrb[44].mxu0 }
 0x503   :  { %v856_v5 = vpop.f32.mrb[45].mxu0  ;;  %v885_v2 = vadd.f32 %v1453_v3, %v764_v45 }
 0x504   :  { %v883_v9 = vadd.f32 %v856_v5, %v762_v38  ;;  %v1454_v1 = vpop.f32.mrb[46].mxu0  ;;  %1503 = vmatmul.mubr.f32.gmra.mrb[42].mxu1 %v882_v61 }
 0x505   :  { %v859_v18 = vpop.f32.mrb[47].mxu0  ;;  %v886_v20 = vadd.f32 %v1454_v1, %v765_v44 }
 0x506   :  { %v884_v15 = vadd.f32 %v859_v18, %v763_v33  ;;  %1505 = vmatprep.mubr.f32.mxu1 %v883_v9 }
 0x508   :  { %1506 = vmatmul.mubr.f32.gmra.mrb[44].mxu1 %v884_v15 }
 0x509   :  { %1508 = vmatprep.mubr.f32.mxu1 %v885_v2 }
 0x50c   :  { %1509 = vmatmul.mubr.f32.gmra.mrb[46].mxu1 %v886_v20 }
 0x5c3   :  { %v1489_v7 = vpop.f32.mrb[32].mxu1 }
 0x5c4   :  { %v984_v8 = vadd.f32 %v1489_v7, %v1102_v22  ;;  %v978_v25 = vpop.f32.mrb[33].mxu1 }
 0x5c5   :  { %v979_v13 = vadd.f32 %v1102_v22, %v978_v25 }
 0x5c6   :  { %1058 = vst [vmem:[#allocation10 + $0x8] sm:$0xff] %v984_v8 }
 0x5c7   :  { %1057 = vst [vmem:[#allocation10] sm:$0xff] %v979_v13  ;;  %v1492_v10 = vpop.f32.mrb[34].mxu1 }
 0x5c8   :  { %v994_v26 = vadd.f32 %v1492_v10, %v1102_v22  ;;  %v988_v14 = vpop.f32.mrb[35].mxu1 }
 0x5c9   :  { %v989_v16 = vadd.f32 %v1102_v22, %v988_v14 }
 0x5ca   :  { %1060 = vst [vmem:[#allocation10 + $0x18] sm:$0xff] %v994_v26 }
 0x5cb   :  { %1059 = vst [vmem:[#allocation10 + $0x10] sm:$0xff] %v989_v16  ;;  %v1495_v29 = vpop.f32.mrb[36].mxu1 }
 0x5cc   :  { %v1004_v19 = vadd.f32 %v1495_v29, %v1102_v22  ;;  %v998_v30 = vpop.f32.mrb[37].mxu1 }
 0x5cd   :  { %v999_v31 = vadd.f32 %v1102_v22, %v998_v30 }
 0x5ce   :  { %1062 = vst [vmem:[#allocation10 + $0x28] sm:$0xff] %v1004_v19 }
 0x5cf   :  { %1061 = vst [vmem:[#allocation10 + $0x20] sm:$0xff] %v999_v31  ;;  %v1498_v32 = vpop.f32.mrb[38].mxu1 }
 0x5d0   :  { %v1014_v27 = vadd.f32 %v1498_v32, %v1102_v22  ;;  %v1008_v35 = vpop.f32.mrb[39].mxu1 }
 0x5d1   :  { %v1009_v28 = vadd.f32 %v1102_v22, %v1008_v35 }
 0x5d2   :  { %1064 = vst [vmem:[#allocation10 + $0x38] sm:$0xff] %v1014_v27 }
 0x5d3   :  { %1063 = vst [vmem:[#allocation10 + $0x30] sm:$0xff] %v1009_v28  ;;  %v1501_v36 = vpop.f32.mrb[40].mxu1 }
 0x5d4   :  { %v1024_v37 = vadd.f32 %v1501_v36, %v1102_v22  ;;  %v1018_v33 = vpop.f32.mrb[41].mxu1 }
 0x5d5   :  { %v1019_v38 = vadd.f32 %v1102_v22, %v1018_v33 }
 0x5d6   :  { %1066 = vst [vmem:[#allocation10 + $0x48] sm:$0xff] %v1024_v37 }
 0x5d7   :  { %1065 = vst [vmem:[#allocation10 + $0x40] sm:$0xff] %v1019_v38  ;;  %v1504_v34 = vpop.f32.mrb[42].mxu1 }
 0x5d8   :  { %v1034_v39 = vadd.f32 %v1504_v34, %v1102_v22  ;;  %v1028_v40 = vpop.f32.mrb[43].mxu1 }
 0x5d9   :  { %v1029_v41 = vadd.f32 %v1102_v22, %v1028_v40 }
 0x5da   :  { %1068 = vst [vmem:[#allocation10 + $0x58] sm:$0xff] %v1034_v39 }
 0x5db   :  { %1067 = vst [vmem:[#allocation10 + $0x50] sm:$0xff] %v1029_v41  ;;  %v1507_v42 = vpop.f32.mrb[44].mxu1 }
 0x5dc   :  { %v1044_v44 = vadd.f32 %v1507_v42, %v1102_v22  ;;  %v1038_v45 = vpop.f32.mrb[45].mxu1 }
 0x5dd   :  { %v1039_v47 = vadd.f32 %v1102_v22, %v1038_v45 }
 0x5de   :  { %1070 = vst [vmem:[#allocation10 + $0x68] sm:$0xff] %v1044_v44 }
 0x5df   :  { %1069 = vst [vmem:[#allocation10 + $0x60] sm:$0xff] %v1039_v47  ;;  %v1510_v54 = vpop.f32.mrb[46].mxu1 }
 0x5e0   :  { %v1054_v53 = vadd.f32 %v1510_v54, %v1102_v22  ;;  %v1048_v60 = vpop.f32.mrb[47].mxu1 }
 0x5e1   :  { %v1049_v17 = vadd.f32 %v1102_v22, %v1048_v60 }
 0x5e2   :  { %1072 = vst [vmem:[#allocation10 + $0x78] sm:$0xff] %v1054_v53 }
 0x5e3   :  { %1071 = vst [vmem:[#allocation10 + $0x70] sm:$0xff] %v1049_v17 }
 0x5e4   :  { %1725 = shalt.err (!%p1722_p8)
}
 0x5e5   :  { %s1726_s20 = scalar_lea.hbm %s2217_s4, 2048 }
 0x5e6   :  { %p1727_p9 = scmp.ne.s32.totalorder %s2217_s4, %s1726_s20  ;;  %p1730_p10 = scmp.lt.u32.totalorder %s1726_s20, %s2217_s4 }
 0x5e8   :  { %p1732_p11 = pnand %p1730_p10, %p1727_p9 }
 0x5ea   :  { %1735 = shalt.err (!%p1732_p11)
}
 0x5eb   :  { %1084 = dma.vmem_to_hbm [thread:$0]  %s1079_s16, 2048, %s2217_s4, [#allocation4], %s1745_s25, %s1745_s25, %s1746_s26  }
 0x5ec   :  { %1742 = dma.done.wait [#allocation4], 2048  }
 0x5ed   :  { %1743 = vsyncadd [#allocation4], 4294965248 }
 0x5ee   :  { %1088 = vsyncpa [#allocation3], 1 }
 0x5ef   :  { %1089 = vsyncpa [#allocation6], 1 }
 0x5f0   :  { %1090 = vsyncpa [#allocation9], 1 }
 0x5f1   :  { %1091 = vsyncpa [#allocation4], 1 }

</bundles_post_ra>
